<compile_context>
chip_gen: v7x
topology: tpu7x:2x2x1
jax: 0.10.0
libtpu: 0.0.40
codegen_flags: <defaults>
</compile_context>

<pallas_src>
import functools

import jax
import jax.numpy as jnp
from jax.experimental import pallas as pl
from jax.experimental.pallas import tpu as pltpu


def _pseudo_mamba_kernel(x_ref, wg_ref, bg_ref, wd_ref, bd_ref, m_ref, o_ref,
                         *, H, W):
    """One packed block (Bt batch elements x C channels) per grid step.

    x_ref  : (1, P, HW)   P = Bt*C packed rows (batch-major, channel-minor)
    wg_ref : (P, P)       block-diagonal 1x1-conv weight [out, in]  (MXU path), or
             (P, P, 1)    per-Cin columns of the same               (tiny-P VPU path)
    bg_ref : (P, 1)       1x1-conv bias (tiled over Bt)
    wd_ref : (9, P, 1)    depthwise 3x3 weight, tap-major (kh*3+kw, P, 1)
    bd_ref : (P, 1)       depthwise bias (tiled over Bt)
    m_ref  : (9, HW)      precomputed per-tap border-validity masks (row 4 unused)
    o_ref  : (1, P, HW)   output
    """
    HW = H * W
    P = x_ref.shape[1]

    x2d = x_ref[0].astype(jnp.float32)                          # (P, HW)

    # ---- state = depthwise 3x3 conv (padding=1, groups=C) ----------------
    # Done first so `gate` is not live across the tap loop (3 live (P,HW)
    # f32 temps instead of 4).  Halo via two long XLU rolls (row above /
    # below) reused for the corner taps with single-lane rolls; each
    # off-center tap is: roll -> mask-mul -> weight-mul -> add.
    state = bd_ref[...] + wd_ref[4] * x2d                        # bias + center tap
    bases = {
        -1: pltpu.roll(x2d, W, axis=1),          # t[p] = x[p - W]  (row above)
        0: x2d,
        1: pltpu.roll(x2d, HW - W, axis=1),      # t[p] = x[p + W]  (row below)
    }
    for dh in (-1, 0, 1):
        for dw in (-1, 0, 1):
            if dh == 0 and dw == 0:
                continue
            g = bases[dh]
            if dw == -1:
                t = pltpu.roll(g, 1, axis=1)             # t[p] = g[p - 1]
            elif dw == 1:
                t = pltpu.roll(g, HW - 1, axis=1)        # t[p] = g[p + 1]
            else:
                t = g
            tap = (dh + 1) * 3 + (dw + 1)
            state = state + wd_ref[tap] * (t * m_ref[tap:tap + 1, :])

    # ---- gate = sigmoid(1x1 conv) -----------------------------------------
    if len(wg_ref.shape) == 2:
        # Block-diagonal channel matmul on the (otherwise idle) MXU; one
        # matmul covers every packed batch element without cross-batch mixing.
        gate_pre = jnp.dot(wg_ref[...], x_ref[0].astype(wg_ref.dtype),
                           preferred_element_type=jnp.float32)
    else:
        # Degenerate tiny P: unrolled VPU multiply-accumulate over input rows.
        gate_pre = wg_ref[0] * x2d[0:1, :]
        for j in range(1, P):
            gate_pre = gate_pre + wg_ref[j] * x2d[j:j + 1, :]
    gate = jax.nn.sigmoid(gate_pre + bg_ref[...])                # (P, HW)

    # ---- out = gate*x + (1-gate)*state  (fused blend, one extra temp) -----
    o_ref[0] = (state + gate * (x2d - state)).astype(o_ref.dtype)


def _pick_bt(B, C, HW, itemsize):
    """Largest divisor of B keeping the packed block small (<=64 rows, <=1 MiB)."""
    best = 1
    for bt in range(1, B + 1):
        if B % bt:
            continue
        if bt * C > 64 or bt * C * HW * itemsize > (1 << 20):
            break
        best = bt
    return best


@jax.jit
def pseudo_mamba_scan(x_nchw, wg, bg, wd, bd):
    """x_nchw: (B, C, H, W); wg: (C, C) [out,in]; bg: (C,); wd: (C, 3, 3); bd: (C,)."""
    B, C, H, W = x_nchw.shape
    HW = H * W
    itemsize = jnp.dtype(x_nchw.dtype).itemsize

    # TODO(synk): if H*W is not a multiple of 128, pad W -> W' in the wrapper
    # (extending the tap masks to zero the pad lanes) so output stores stay
    # lane-dense, and slice the pad off after the call.

    # Pack Bt batch elements into the channel/sublane axis (free contiguous
    # reshape): fills sublanes for small C and amortizes per-step overhead.
    Bt = _pick_bt(B, C, HW, itemsize)
    P = Bt * C
    x_packed = x_nchw.reshape(B // Bt, P, HW)

    # ---- parameters laid out for the packed (P, HW) block -----------------
    use_mxu = P >= 8
    wg_big = jnp.kron(jnp.eye(Bt, dtype=jnp.float32),
                      wg.astype(jnp.float32))                    # (P, P) block-diag
    if use_mxu:
        # bf16 operands hit native MXU throughput when the activations are
        # bf16; keep f32 operands for f32 inputs to preserve accuracy.
        gdtype = jnp.bfloat16 if x_nchw.dtype == jnp.bfloat16 else jnp.float32
        wg_k = wg_big.astype(gdtype)                             # (P, P)
        wg_spec = pl.BlockSpec((P, P), lambda b: (0, 0))
    else:
        wg_k = jnp.transpose(wg_big, (1, 0))[:, :, None]         # (Pin, Pout, 1)
        wg_spec = pl.BlockSpec((P, P, 1), lambda b: (0, 0, 0))

    bg_k = jnp.tile(bg.astype(jnp.float32), Bt).reshape(P, 1)
    wd_k = jnp.tile(jnp.transpose(wd, (1, 2, 0)).reshape(9, C).astype(jnp.float32),
                    (1, Bt)).reshape(9, P, 1)
    bd_k = jnp.tile(bd.astype(jnp.float32), Bt).reshape(P, 1)

    # ---- precomputed per-tap border-validity masks (no in-kernel iota) ----
    p = jnp.arange(HW, dtype=jnp.int32)
    col = p % W
    row_ok = {-1: p >= W, 0: jnp.ones((HW,), jnp.bool_), 1: p < HW - W}
    col_ok = {-1: col >= 1, 0: jnp.ones((HW,), jnp.bool_), 1: col <= W - 2}
    tap_masks = jnp.stack(
        [(row_ok[dh] & col_ok[dw]).astype(jnp.float32)
         for dh in (-1, 0, 1) for dw in (-1, 0, 1)], axis=0)     # (9, HW)

    kernel = functools.partial(_pseudo_mamba_kernel, H=H, W=W)

    # VMEM budget: double-buffered in/out blocks + in-kernel f32 temps.
    block_bytes = P * HW * itemsize
    temps_bytes = 6 * P * HW * 4 + 9 * HW * 4
    vmem_limit = int(min(64 << 20, max(2 * (4 * block_bytes + temps_bytes), 32 << 20)))

    # TODO(synk): for production C*HW (esp. v7x's 64 MiB VMEM / 2 TensorCores)
    # add a second parallel grid axis over row blocks with a 1-row halo
    # instead of holding the full (P, H*W) image per grid step.
    out_packed = pl.pallas_call(
        kernel,
        out_shape=jax.ShapeDtypeStruct((B // Bt, P, HW), x_nchw.dtype),
        grid_spec=pltpu.PrefetchScalarGridSpec(
            num_scalar_prefetch=0,
            grid=(B // Bt,),
            in_specs=[
                pl.BlockSpec((1, P, HW), lambda b: (b, 0, 0)),
                wg_spec,
                pl.BlockSpec((P, 1), lambda b: (0, 0)),
                pl.BlockSpec((9, P, 1), lambda b: (0, 0, 0)),
                pl.BlockSpec((P, 1), lambda b: (0, 0)),
                pl.BlockSpec((9, HW), lambda b: (0, 0)),
            ],
            out_specs=pl.BlockSpec((1, P, HW), lambda b: (b, 0, 0)),
        ),
        compiler_params=pltpu.CompilerParams(
            dimension_semantics=("parallel",),
            vmem_limit_bytes=vmem_limit),
    )(x_packed, wg_k, bg_k, wd_k, bd_k, tap_masks)

    return out_packed.reshape(B, C, H, W)


def _reference(x_nchw, wg, bg, wd, bd):
    """Pure-JAX reference mirroring the PyTorch forward (NCHW, elementwise gate)."""
    B, C, H, W = x_nchw.shape
    gate_pre = (wg[None, :, :, None, None] * x_nchw[:, None, :, :, :]).sum(axis=2)
    gate = jax.nn.sigmoid(gate_pre + bg[None, :, None, None])
    xp = jnp.pad(x_nchw, ((0, 0), (0, 0), (1, 1), (1, 1)))
    state = jnp.zeros_like(x_nchw)
    for kh in range(3):
        for kw in range(3):
            state = state + xp[:, :, kh:kh + H, kw:kw + W] * wd[None, :, kh, kw, None, None]
    state = state + bd[None, :, None, None]
    return gate * x_nchw + (1.0 - gate) * state


if __name__ == "__main__":
    key = jax.random.PRNGKey(0)
    B, C, H, W = 2, 4, 16, 16

    k_x, k_wg, k_bg, k_wd, k_bd = jax.random.split(key, 5)
    x = jax.random.normal(k_x, (B, C, H, W), dtype=jnp.float32)
    # Deterministic synthetic parameters (shapes match nn.Conv2d in __init__).
    wg = 0.2 * jax.random.normal(k_wg, (C, C), dtype=jnp.float32)     # Conv2d(dim,dim,1).weight[:,:,0,0]
    bg = 0.1 * jax.random.normal(k_bg, (C,), dtype=jnp.float32)
    wd = 0.2 * jax.random.normal(k_wd, (C, 3, 3), dtype=jnp.float32)  # depthwise weight[:,0,:,:]
    bd = 0.1 * jax.random.normal(k_bd, (C,), dtype=jnp.float32)

    out = pseudo_mamba_scan(x, wg, bg, wd, bd)
    out = jax.block_until_ready(out)

    ref = _reference(x, wg, bg, wd, bd)
    assert out.shape == (B, C, H, W)
    assert out.dtype == x.dtype
    # Tolerance allows for reduced-precision MXU passes in the gate matmul;
    # the depthwise-tap / blend math is exact f32.
    assert jnp.max(jnp.abs(out - ref)) < 1e-2

    print("KERNEL_OK")
</pallas_src>

<mosaic_0001>
module attributes {stable_mosaic.version = 11 : i64} {
  func.func @_pseudo_mamba_kernel(%arg0: i32, %arg1: memref<1x8x256xf32, #tpu.memory_space<vmem>>, %arg2: memref<8x8xf32, #tpu.memory_space<vmem>>, %arg3: memref<8x1xf32, #tpu.memory_space<vmem>>, %arg4: memref<9x8x1xf32, #tpu.memory_space<vmem>>, %arg5: memref<8x1xf32, #tpu.memory_space<vmem>>, %arg6: memref<9x256xf32, #tpu.memory_space<vmem>>, %arg7: memref<1x8x256xf32, #tpu.memory_space<vmem>>) attributes {dimension_semantics = [#tpu.dimension_semantics<parallel>], iteration_bounds = array<i64: 1>, scalar_prefetch = 0 : i64, scratch_operands = 0 : i64, tpu.core_type = #tpu.core_type<tc>, window_params = [{transform_indices = @transform_0, window_bounds = array<i64: 1, 8, 256>}, {pipeline_mode = #tpu.pipeline_mode<synchronous>, transform_indices = @transform_1, window_bounds = array<i64: 8, 8>}, {pipeline_mode = #tpu.pipeline_mode<synchronous>, transform_indices = @transform_2, window_bounds = array<i64: 8, 1>}, {pipeline_mode = #tpu.pipeline_mode<synchronous>, transform_indices = @transform_3, window_bounds = array<i64: 9, 8, 1>}, {pipeline_mode = #tpu.pipeline_mode<synchronous>, transform_indices = @transform_4, window_bounds = array<i64: 8, 1>}, {pipeline_mode = #tpu.pipeline_mode<synchronous>, transform_indices = @transform_5, window_bounds = array<i64: 9, 256>}, {transform_indices = @transform_6, window_bounds = array<i64: 1, 8, 256>}]} {
    %c0 = arith.constant 0 : index
    %c0_0 = arith.constant 0 : index
    %c0_1 = arith.constant 0 : index
    %0 = vector.load %arg1[%c0, %c0_0, %c0_1] : memref<1x8x256xf32, #tpu.memory_space<vmem>>, vector<1x8x256xf32>
    %1 = vector.shape_cast %0 : vector<1x8x256xf32> to vector<8x256xf32>
    %c0_2 = arith.constant 0 : index
    %c0_3 = arith.constant 0 : index
    %2 = vector.load %arg5[%c0_2, %c0_3] : memref<8x1xf32, #tpu.memory_space<vmem>>, vector<8x1xf32>
    %c4 = arith.constant 4 : index
    %c0_4 = arith.constant 0 : index
    %c0_5 = arith.constant 0 : index
    %3 = vector.load %arg4[%c4, %c0_4, %c0_5] : memref<9x8x1xf32, #tpu.memory_space<vmem>>, vector<1x8x1xf32>
    %4 = vector.shape_cast %3 : vector<1x8x1xf32> to vector<8x1xf32>
    %5 = vector.broadcast %4 : vector<8x1xf32> to vector<8x256xf32>
    %6 = arith.mulf %5, %1 : vector<8x256xf32>
    %7 = vector.broadcast %2 : vector<8x1xf32> to vector<8x256xf32>
    %8 = arith.addf %7, %6 : vector<8x256xf32>
    %c16_i32 = arith.constant 16 : i32
    %9 = tpu.dynamic_rotate %1 by %c16_i32 dim 1 : vector<8x256xf32>, i32 -> vector<8x256xf32>
    %c240_i32 = arith.constant 240 : i32
    %10 = tpu.dynamic_rotate %1 by %c240_i32 dim 1 : vector<8x256xf32>, i32 -> vector<8x256xf32>
    %c1_i32 = arith.constant 1 : i32
    %11 = tpu.dynamic_rotate %9 by %c1_i32 dim 1 : vector<8x256xf32>, i32 -> vector<8x256xf32>
    %c0_6 = arith.constant 0 : index
    %c0_7 = arith.constant 0 : index
    %c0_8 = arith.constant 0 : index
    %12 = vector.load %arg4[%c0_6, %c0_7, %c0_8] : memref<9x8x1xf32, #tpu.memory_space<vmem>>, vector<1x8x1xf32>
    %13 = vector.shape_cast %12 : vector<1x8x1xf32> to vector<8x1xf32>
    %c0_9 = arith.constant 0 : index
    %c0_10 = arith.constant 0 : index
    %14 = vector.load %arg6[%c0_9, %c0_10] : memref<9x256xf32, #tpu.memory_space<vmem>>, vector<1x256xf32>
    %15 = vector.broadcast %14 : vector<1x256xf32> to vector<8x256xf32>
    %16 = arith.mulf %11, %15 : vector<8x256xf32>
    %17 = vector.broadcast %13 : vector<8x1xf32> to vector<8x256xf32>
    %18 = arith.mulf %17, %16 : vector<8x256xf32>
    %19 = arith.addf %8, %18 : vector<8x256xf32>
    %c1 = arith.constant 1 : index
    %c0_11 = arith.constant 0 : index
    %c0_12 = arith.constant 0 : index
    %20 = vector.load %arg4[%c1, %c0_11, %c0_12] : memref<9x8x1xf32, #tpu.memory_space<vmem>>, vector<1x8x1xf32>
    %21 = vector.shape_cast %20 : vector<1x8x1xf32> to vector<8x1xf32>
    %c1_13 = arith.constant 1 : index
    %c0_14 = arith.constant 0 : index
    %22 = vector.load %arg6[%c1_13, %c0_14] : memref<9x256xf32, #tpu.memory_space<vmem>>, vector<1x256xf32>
    %23 = vector.broadcast %22 : vector<1x256xf32> to vector<8x256xf32>
    %24 = arith.mulf %9, %23 : vector<8x256xf32>
    %25 = vector.broadcast %21 : vector<8x1xf32> to vector<8x256xf32>
    %26 = arith.mulf %25, %24 : vector<8x256xf32>
    %27 = arith.addf %19, %26 : vector<8x256xf32>
    %c255_i32 = arith.constant 255 : i32
    %28 = tpu.dynamic_rotate %9 by %c255_i32 dim 1 : vector<8x256xf32>, i32 -> vector<8x256xf32>
    %c2 = arith.constant 2 : index
    %c0_15 = arith.constant 0 : index
    %c0_16 = arith.constant 0 : index
    %29 = vector.load %arg4[%c2, %c0_15, %c0_16] : memref<9x8x1xf32, #tpu.memory_space<vmem>>, vector<1x8x1xf32>
    %30 = vector.shape_cast %29 : vector<1x8x1xf32> to vector<8x1xf32>
    %c2_17 = arith.constant 2 : index
    %c0_18 = arith.constant 0 : index
    %31 = vector.load %arg6[%c2_17, %c0_18] : memref<9x256xf32, #tpu.memory_space<vmem>>, vector<1x256xf32>
    %32 = vector.broadcast %31 : vector<1x256xf32> to vector<8x256xf32>
    %33 = arith.mulf %28, %32 : vector<8x256xf32>
    %34 = vector.broadcast %30 : vector<8x1xf32> to vector<8x256xf32>
    %35 = arith.mulf %34, %33 : vector<8x256xf32>
    %36 = arith.addf %27, %35 : vector<8x256xf32>
    %c1_i32_19 = arith.constant 1 : i32
    %37 = tpu.dynamic_rotate %1 by %c1_i32_19 dim 1 : vector<8x256xf32>, i32 -> vector<8x256xf32>
    %c3 = arith.constant 3 : index
    %c0_20 = arith.constant 0 : index
    %c0_21 = arith.constant 0 : index
    %38 = vector.load %arg4[%c3, %c0_20, %c0_21] : memref<9x8x1xf32, #tpu.memory_space<vmem>>, vector<1x8x1xf32>
    %39 = vector.shape_cast %38 : vector<1x8x1xf32> to vector<8x1xf32>
    %c3_22 = arith.constant 3 : index
    %c0_23 = arith.constant 0 : index
    %40 = vector.load %arg6[%c3_22, %c0_23] : memref<9x256xf32, #tpu.memory_space<vmem>>, vector<1x256xf32>
    %41 = vector.broadcast %40 : vector<1x256xf32> to vector<8x256xf32>
    %42 = arith.mulf %37, %41 : vector<8x256xf32>
    %43 = vector.broadcast %39 : vector<8x1xf32> to vector<8x256xf32>
    %44 = arith.mulf %43, %42 : vector<8x256xf32>
    %45 = arith.addf %36, %44 : vector<8x256xf32>
    %c255_i32_24 = arith.constant 255 : i32
    %46 = tpu.dynamic_rotate %1 by %c255_i32_24 dim 1 : vector<8x256xf32>, i32 -> vector<8x256xf32>
    %c5 = arith.constant 5 : index
    %c0_25 = arith.constant 0 : index
    %c0_26 = arith.constant 0 : index
    %47 = vector.load %arg4[%c5, %c0_25, %c0_26] : memref<9x8x1xf32, #tpu.memory_space<vmem>>, vector<1x8x1xf32>
    %48 = vector.shape_cast %47 : vector<1x8x1xf32> to vector<8x1xf32>
    %c5_27 = arith.constant 5 : index
    %c0_28 = arith.constant 0 : index
    %49 = vector.load %arg6[%c5_27, %c0_28] : memref<9x256xf32, #tpu.memory_space<vmem>>, vector<1x256xf32>
    %50 = vector.broadcast %49 : vector<1x256xf32> to vector<8x256xf32>
    %51 = arith.mulf %46, %50 : vector<8x256xf32>
    %52 = vector.broadcast %48 : vector<8x1xf32> to vector<8x256xf32>
    %53 = arith.mulf %52, %51 : vector<8x256xf32>
    %54 = arith.addf %45, %53 : vector<8x256xf32>
    %c1_i32_29 = arith.constant 1 : i32
    %55 = tpu.dynamic_rotate %10 by %c1_i32_29 dim 1 : vector<8x256xf32>, i32 -> vector<8x256xf32>
    %c6 = arith.constant 6 : index
    %c0_30 = arith.constant 0 : index
    %c0_31 = arith.constant 0 : index
    %56 = vector.load %arg4[%c6, %c0_30, %c0_31] : memref<9x8x1xf32, #tpu.memory_space<vmem>>, vector<1x8x1xf32>
    %57 = vector.shape_cast %56 : vector<1x8x1xf32> to vector<8x1xf32>
    %c6_32 = arith.constant 6 : index
    %c0_33 = arith.constant 0 : index
    %58 = vector.load %arg6[%c6_32, %c0_33] : memref<9x256xf32, #tpu.memory_space<vmem>>, vector<1x256xf32>
    %59 = vector.broadcast %58 : vector<1x256xf32> to vector<8x256xf32>
    %60 = arith.mulf %55, %59 : vector<8x256xf32>
    %61 = vector.broadcast %57 : vector<8x1xf32> to vector<8x256xf32>
    %62 = arith.mulf %61, %60 : vector<8x256xf32>
    %63 = arith.addf %54, %62 : vector<8x256xf32>
    %c7 = arith.constant 7 : index
    %c0_34 = arith.constant 0 : index
    %c0_35 = arith.constant 0 : index
    %64 = vector.load %arg4[%c7, %c0_34, %c0_35] : memref<9x8x1xf32, #tpu.memory_space<vmem>>, vector<1x8x1xf32>
    %65 = vector.shape_cast %64 : vector<1x8x1xf32> to vector<8x1xf32>
    %c7_36 = arith.constant 7 : index
    %c0_37 = arith.constant 0 : index
    %66 = vector.load %arg6[%c7_36, %c0_37] : memref<9x256xf32, #tpu.memory_space<vmem>>, vector<1x256xf32>
    %67 = vector.broadcast %66 : vector<1x256xf32> to vector<8x256xf32>
    %68 = arith.mulf %10, %67 : vector<8x256xf32>
    %69 = vector.broadcast %65 : vector<8x1xf32> to vector<8x256xf32>
    %70 = arith.mulf %69, %68 : vector<8x256xf32>
    %71 = arith.addf %63, %70 : vector<8x256xf32>
    %c255_i32_38 = arith.constant 255 : i32
    %72 = tpu.dynamic_rotate %10 by %c255_i32_38 dim 1 : vector<8x256xf32>, i32 -> vector<8x256xf32>
    %c8 = arith.constant 8 : index
    %c0_39 = arith.constant 0 : index
    %c0_40 = arith.constant 0 : index
    %73 = vector.load %arg4[%c8, %c0_39, %c0_40] : memref<9x8x1xf32, #tpu.memory_space<vmem>>, vector<1x8x1xf32>
    %74 = vector.shape_cast %73 : vector<1x8x1xf32> to vector<8x1xf32>
    %c8_41 = arith.constant 8 : index
    %c0_42 = arith.constant 0 : index
    %75 = vector.load %arg6[%c8_41, %c0_42] : memref<9x256xf32, #tpu.memory_space<vmem>>, vector<1x256xf32>
    %76 = vector.broadcast %75 : vector<1x256xf32> to vector<8x256xf32>
    %77 = arith.mulf %72, %76 : vector<8x256xf32>
    %78 = vector.broadcast %74 : vector<8x1xf32> to vector<8x256xf32>
    %79 = arith.mulf %78, %77 : vector<8x256xf32>
    %80 = arith.addf %71, %79 : vector<8x256xf32>
    %c0_43 = arith.constant 0 : index
    %c0_44 = arith.constant 0 : index
    %81 = vector.load %arg2[%c0_43, %c0_44] : memref<8x8xf32, #tpu.memory_space<vmem>>, vector<8x8xf32>
    %c0_45 = arith.constant 0 : index
    %c0_46 = arith.constant 0 : index
    %c0_47 = arith.constant 0 : index
    %82 = vector.load %arg1[%c0_45, %c0_46, %c0_47] : memref<1x8x256xf32, #tpu.memory_space<vmem>>, vector<1x8x256xf32>
    %83 = vector.shape_cast %82 : vector<1x8x256xf32> to vector<8x256xf32>
    %cst = arith.constant dense<0.000000e+00> : vector<8x256xf32>
    %84 = tpu.matmul %81, %83, %cst {dimension_numbers = #tpu.dot_dimension_numbers<[1], [0], [0], [1], [0, 0, 1, 1], [], []>} : vector<8x8xf32>, vector<8x256xf32>, vector<8x256xf32> -> vector<8x256xf32>
    %c0_48 = arith.constant 0 : index
    %c0_49 = arith.constant 0 : index
    %85 = vector.load %arg3[%c0_48, %c0_49] : memref<8x1xf32, #tpu.memory_space<vmem>>, vector<8x1xf32>
    %86 = vector.broadcast %85 : vector<8x1xf32> to vector<8x256xf32>
    %87 = arith.addf %84, %86 : vector<8x256xf32>
    %88 = arith.negf %87 : vector<8x256xf32>
    %89 = math.exp %88 : vector<8x256xf32>
    %cst_50 = arith.constant 1.000000e+00 : f32
    %90 = vector.broadcast %cst_50 : f32 to vector<8x256xf32>
    %91 = arith.addf %90, %89 : vector<8x256xf32>
    %92 = arith.divf %90, %91 : vector<8x256xf32>
    %93 = arith.subf %1, %80 : vector<8x256xf32>
    %94 = arith.mulf %92, %93 : vector<8x256xf32>
    %95 = arith.addf %80, %94 : vector<8x256xf32>
    %c0_51 = arith.constant 0 : index
    %c0_52 = arith.constant 0 : index
    %c0_53 = arith.constant 0 : index
    %96 = vector.load %arg7[%c0_51, %c0_52, %c0_53] : memref<1x8x256xf32, #tpu.memory_space<vmem>>, vector<1x8x256xf32>
    %97 = vector.shape_cast %96 : vector<1x8x256xf32> to vector<8x256xf32>
    %98 = vector.shape_cast %95 : vector<8x256xf32> to vector<1x8x256xf32>
    tpu.vector_store %arg7[%c0_51, %c0_52, %c0_53], %98 {strides = array<i32>} : memref<1x8x256xf32, #tpu.memory_space<vmem>>, vector<1x8x256xf32>,
    return
  }
  func.func @transform_0(%arg0: i32) -> (i32, i32, i32) {
    %c0_i32 = arith.constant 0 : i32
    %c0_i32_0 = arith.constant 0 : i32
    %c0_i32_1 = arith.constant 0 : i32
    return %arg0, %c0_i32, %c0_i32_0 : i32, i32, i32
  }
  func.func @transform_1(%arg0: i32) -> (i32, i32) {
    %c0_i32 = arith.constant 0 : i32
    %c0_i32_0 = arith.constant 0 : i32
    %c0_i32_1 = arith.constant 0 : i32
    return %c0_i32, %c0_i32_0 : i32, i32
  }
  func.func @transform_2(%arg0: i32) -> (i32, i32) {
    %c0_i32 = arith.constant 0 : i32
    %c0_i32_0 = arith.constant 0 : i32
    %c0_i32_1 = arith.constant 0 : i32
    return %c0_i32, %c0_i32_0 : i32, i32
  }
  func.func @transform_3(%arg0: i32) -> (i32, i32, i32) {
    %c0_i32 = arith.constant 0 : i32
    %c0_i32_0 = arith.constant 0 : i32
    %c0_i32_1 = arith.constant 0 : i32
    %c0_i32_2 = arith.constant 0 : i32
    return %c0_i32, %c0_i32_0, %c0_i32_1 : i32, i32, i32
  }
  func.func @transform_4(%arg0: i32) -> (i32, i32) {
    %c0_i32 = arith.constant 0 : i32
    %c0_i32_0 = arith.constant 0 : i32
    %c0_i32_1 = arith.constant 0 : i32
    return %c0_i32, %c0_i32_0 : i32, i32
  }
  func.func @transform_5(%arg0: i32) -> (i32, i32) {
    %c0_i32 = arith.constant 0 : i32
    %c0_i32_0 = arith.constant 0 : i32
    %c0_i32_1 = arith.constant 0 : i32
    return %c0_i32, %c0_i32_0 : i32, i32
  }
  func.func @transform_6(%arg0: i32) -> (i32, i32, i32) {
    %c0_i32 = arith.constant 0 : i32
    %c0_i32_0 = arith.constant 0 : i32
    %c0_i32_1 = arith.constant 0 : i32
    return %arg0, %c0_i32, %c0_i32_0 : i32, i32, i32
  }
}

</mosaic_0001>

<bundles_post_ra>
// kernel: tile.17
= control target key start
LH: loop header
LB: loop body
LE: loop exit
PB: predicated region body
PF: predicated region fallthrough
CT: control target
= control target key end

     0   :  { %s22_s0 = inlined_call_operand.vmem [shape: f32[4], index: 0, kind: input, shape index: {}]   ;;  %s23_s1 = inlined_call_operand.vmem [shape: f32[2,4], index: 1, kind: output, shape index: {}]  }
   0x1   :  { %v4_v0 = vld [vmem:[%s22_s0] ss:$0 sm:$0xff] }
   0x2   :  { %5 = vst [vmem:[%s23_s1] sm:$0x3] %v4_v0 }

// kernel: tile.1
= control target key start
LH: loop header
LB: loop body
LE: loop exit
PB: predicated region body
PF: predicated region fallthrough
CT: control target
= control target key end

     0   :  { %s34_s8 = smov 125   ;;  %vm7_vm0 = vcmask 7168   ;;  %s35_s11 = smov 126   ;;  %s61_s0 = inlined_call_operand.vmem [shape: f32[2,4], index: 0, kind: input, shape index: {}]   ;;  %s62_s1 = inlined_call_operand.vmem [shape: f32[8,1], index: 1, kind: output, shape index: {}]  }
   0x1   :  { %v4_v0 = vld [vmem:[%s61_s0] sm:$0x3]  ;;  %s33_s0 = smov 127  }
   0x2   :  { %5 = vst [vmem:[#allocation0] sm:$0x3] %v4_v0 }
   0x9   :  { %v9_v1 = vld [vmem:[#allocation0] sm:$0x3]  }
   0xa   :  { %v21_v2 = vld [vmem:[#allocation0] sm:$0x3]   ;;  %10 = vrot.lane.b32.xlu0 %v9_v1, %s33_s0 }
   0xb   :  { %22 = vrot.lane.b32.xlu1 %v21_v2, %s34_s8  ;;  %v6_v3 = vld [vmem:[#allocation0] sm:$0x3]  }
   0xc   :  { %v15_v4 = vld [vmem:[#allocation0] sm:$0x3]   ;;  %8 = vst.msk [vmem:[%s62_s1] ss:$4 sm:$0x3] %vm7_vm0, %v6_v3  }
   0xe   :  { %16 = vrot.lane.b32.xlu0 %v15_v4, %s35_s11 }
  0x7c   :  { %v11_v5 = vpop.permute.xlu0 %10  }
  0x7d   :  { %v23_v6 = vpop.permute.xlu1 %22   ;;  %27 = vst.msk [vmem:[%s62_s1 + $0x1] ss:$4 sm:$0x3] %vm7_vm0, %v11_v5  }
  0x7e   :  { %29 = vst.msk [vmem:[%s62_s1 + $0x3] ss:$4 sm:$0x3] %vm7_vm0, %v23_v6  }
  0x80   :  { %v17_v7 = vpop.permute.xlu0 %16  }
  0x81   :  { %28 = vst.msk [vmem:[%s62_s1 + $0x2] ss:$4 sm:$0x3] %vm7_vm0, %v17_v7  }

// kernel: pseudo_mamba_scan.1
= control target key start
LH: loop header
LB: loop body
LE: loop exit
PB: predicated region body
PF: predicated region fallthrough
CT: control target
= control target key end

     0   :  { %v442_v1 = vmov 0   ;;  %v443_v2 = vmov 0.0   ;;  %s444_s23 = smov 112   ;;  %s445_s24 = smov 16   ;;  %vm309_vm0 = vcmask 64512   ;;  %v46_v14 = vlaneseq  ;;  %s655_s0 = inlined_call_operand.vmem [shape: f32[1,8,256], index: 0, kind: input, shape index: {}]   ;;  %s656_s1 = inlined_call_operand.vmem [shape: f32[8,8], index: 1, kind: input, shape index: {}]   ;;  %s657_s3 = inlined_call_operand.vmem [shape: f32[9,8,1], index: 3, kind: input, shape index: {}]   ;;  %s658_s2 = inlined_call_operand.vmem [shape: f32[8,1], index: 2, kind: input, shape index: {}]   ;;  %s659_s4 = inlined_call_operand.vmem [shape: f32[8,1], index: 4, kind: input, shape index: {}]   ;;  %s660_s5 = inlined_call_operand.vmem [shape: f32[9,256], index: 5, kind: input, shape index: {}]   ;;  %s661_s6 = inlined_call_operand.vmem [shape: f32[1,8,256], index: 6, kind: output, shape index: {}]  }
   0x1   :  { %v486_v0 = vld [vmem:[%s655_s0] sm:$0xff]  ;;  %433 = vset.pattern.permute.xlu1 %v442_v1  ;;  %377 = vmatprep.mubr.f32.mxu0 %v443_v2  ;;  %v493_v3 = vld [vmem:[%s655_s0 + $0x8] sm:$0xff]  ;;  %v411_v10 = vld [vmem:[%s657_s3 + $0x10] sm:$0xff]  ;;  %s446_s17 = smov 1   ;;  %s447_s20 = smov 127  }
   0x2   :  { %51 = vrot.lane.b32.xlu1 %v486_v0, %s444_s23  ;;  %42 = vrot.lane.b32.xlu0 %v486_v0, %s445_s24  ;;  %v302_v4 = vld [vmem:[%s656_s1] sm:$0xff]  ;;  %v409_v9 = vld [vmem:[%s657_s3 + $0x8] sm:$0xff]  ;;  %v69_v15 = vshrl.u32 %v46_v14, 7  ;;  %v537_v16 = vand.u32 127, %v46_v14 }
   0x3   :  { %313 = vmatprep.subr.mxu0 %v493_v3  ;;  %432 = vset.pattern.permute.xlu0 %v442_v1  ;;  %v408_v5 = vld [vmem:[%s657_s3 + $0x20] sm:$0xff]  ;;  %v413_v11 = vld [vmem:[%s657_s3 + $0x18] sm:$0xff]  ;;  %v415_v12 = vld [vmem:[%s657_s3 + $0x28] sm:$0xff] }
   0x4   :  { %314 = vmatpush1.msra.mxu0 %v486_v0  ;;  %v303_v6 = vld [vmem:[%s658_s2] sm:$0xff]  ;;  %v417_v13 = vld [vmem:[%s657_s3 + $0x30] sm:$0xff]  ;;  %v539_v17 = vsub.s32 0, %v69_v15  ;;  %v541_v18 = vsub.s32 1, %v69_v15  ;;  %vm48_vm1 = vcmp.lt.s32.totalorder %v537_v16, 16  ;;  %vm55_vm2 = vcmp.lt.s32.totalorder %v537_v16, 112 }
   0x5   :  { %423 = vmatmul.mubr.msk.f32.vlgmr.msra.gmra.mrb[0].mxu0 %vm309_vm0, %v302_v4  ;;  %v25_v7 = vld [vmem:[%s659_s4] sm:$0xff]  ;;  %v419_v37 = vld [vmem:[%s657_s3 + $0x38] sm:$0xff]  ;;  %vm62_vm3 = vcmp.lt.s32.totalorder %v537_v16, 1  ;;  %vm119_vm4 = vcmp.lt.s32.totalorder %v537_v16, 127 }
   0x6   :  { %53 = vrot.lane.b32.xlu1 %v493_v3, %s444_s23  ;;  %44 = vrot.lane.b32.xlu0 %v493_v3, %s445_s24  ;;  %v65_v8 = vld [vmem:[%s657_s3] sm:$0xff] }
   0x7   :  { %v410_v19 = vld [vmem:[%s660_s5 + $0x1] ss:$8 sm:$0x3]  ;;  %v420_v20 = vld [vmem:[%s660_s5 + $0x7] ss:$8 sm:$0x3] }
   0x8   :  { %v97_v23 = vrot.slane %v410_v19, %v539_v17  ;;  %v101_v24 = vrot.slane %v410_v19, %v541_v18  ;;  %v252_v25 = vrot.slane %v420_v20, %v539_v17  ;;  %v256_v26 = vrot.slane %v420_v20, %v541_v18  ;;  %v421_v38 = vld [vmem:[%s657_s3 + $0x40] sm:$0xff] }
   0x9   :  { %v414_v45 = vld [vmem:[%s660_s5 + $0x3] ss:$8 sm:$0x3]  ;;  %v416_v56 = vld [vmem:[%s660_s5 + $0x5] ss:$8 sm:$0x3] }
   0xa   :  { %30 = vperm.xlu1 %433, %v408_v5   ;;  %306 = vperm.xlu0 %432, %v303_v6   ;;  %v162_v48 = vrot.slane %v414_v45, %v539_v17  ;;  %v166_v49 = vrot.slane %v414_v45, %v541_v18  ;;  %v194_v58 = vrot.slane %v416_v56, %v539_v17  ;;  %v66_v6 = vld [vmem:[%s660_s5] ss:$8 sm:$0x3] }
   0xb   :  { %v198_v59 = vrot.slane %v416_v56, %v541_v18 }
   0xe   :  { %37 = vperm.xlu1 %433, %v25_v7   ;;  %82 = vperm.xlu0 %432, %v65_v8   ;;  %v71_v7 = vrot.slane %v66_v6, %v539_v17  ;;  %v75_v8 = vrot.slane %v66_v6, %v541_v18 }
  0x12   :  { %108 = vperm.xlu1 %433, %v409_v9   ;;  %141 = vperm.xlu0 %432, %v411_v10   ;;  %v412_v10 = vld [vmem:[%s660_s5 + $0x2] ss:$8 sm:$0x3] }
  0x16   :  { %173 = vperm.xlu1 %433, %v413_v11   ;;  %205 = vperm.xlu0 %432, %v415_v12  }
  0x1a   :  { %148 = vrot.lane.b32.xlu1 %v486_v0, %s446_s17  ;;  %150 = vrot.lane.b32.xlu0 %v493_v3, %s446_s17 }
  0x1e   :  { %237 = vperm.xlu1 %433, %v417_v13   ;;  %180 = vrot.lane.b32.xlu0 %v486_v0, %s447_s20 }
  0x22   :  { %182 = vrot.lane.b32.xlu1 %v493_v3, %s447_s20 }
  0x74   :  { %v43_v21 = vpop.permute.xlu0 %42  ;;  %v52_v22 = vpop.permute.xlu1 %51 }
  0x78   :  { %v45_v27 = vpop.permute.xlu0 %44  ;;  %v54_v28 = vpop.permute.xlu1 %53 }
  0x79   :  { %v50_v29 = vsel %vm48_vm1, %v45_v27, %v43_v21  ;;  %v49_v30 = vsel %vm48_vm1, %v43_v21, %v45_v27  ;;  %v57_v31 = vsel %vm55_vm2, %v54_v28, %v52_v22  ;;  %v56_v32 = vsel %vm55_vm2, %v52_v22, %v54_v28 }
  0x7a   :  { %58 = vrot.lane.b32.xlu0 %v50_v29, %s446_s17  ;;  %60 = vrot.lane.b32.xlu1 %v49_v30, %s446_s17  ;;  %v557_v33 = vmul.f32 %v97_v23, %v50_v29  ;;  %v559_v34 = vmul.f32 %v101_v24, %v49_v30  ;;  %v561_v35 = vmul.f32 %v252_v25, %v56_v32 }
  0x7b   :  { %v563_v36 = vmul.f32 %v256_v26, %v57_v31  ;;  %v130_v22 = vrot.slane %v412_v10, %v539_v17  ;;  %v134_v23 = vrot.slane %v412_v10, %v541_v18 }
  0x7e   :  { %115 = vrot.lane.b32.xlu0 %v50_v29, %s447_s20  ;;  %117 = vrot.lane.b32.xlu1 %v49_v30, %s447_s20 }
  0x82   :  { %263 = vperm.xlu0 %432, %v419_v37   ;;  %295 = vperm.xlu1 %433, %v421_v38  }
  0x86   :  { %214 = vrot.lane.b32.xlu0 %v57_v31, %s446_s17  ;;  %212 = vrot.lane.b32.xlu1 %v56_v32, %s446_s17 }
  0x89   :  { %v31_v39 = vpop.permute.xlu1 %30  ;;  %v307_v40 = vpop.permute.xlu0 %306 }
  0x8a   :  { %270 = vrot.lane.b32.xlu0 %v56_v32, %s447_s20  ;;  %272 = vrot.lane.b32.xlu1 %v57_v31, %s447_s20  ;;  %v33_v9 = vmul.f32 %v31_v39, %v486_v0  ;;  %v34_v11 = vmul.f32 %v31_v39, %v493_v3 }
  0x8d   :  { %v38_v41 = vpop.permute.xlu1 %37  ;;  %v83_v42 = vpop.permute.xlu0 %82 }
  0x8e   :  { %v40_v24 = vadd.f32 %v38_v41, %v33_v9  ;;  %v41_v26 = vadd.f32 %v38_v41, %v34_v11 }
  0x91   :  { %v109_v43 = vpop.permute.xlu1 %108  ;;  %v142_v44 = vpop.permute.xlu0 %141 }
  0x92   :  { %v111_v27 = vmul.f32 %v109_v43, %v557_v33  ;;  %v112_v32 = vmul.f32 %v109_v43, %v559_v34 }
  0x95   :  { %v174_v46 = vpop.permute.xlu1 %173  ;;  %v580_v47 = vpop.permute.xlu0 %205 }
  0x99   :  { %v149_v50 = vpop.permute.xlu1 %148  ;;  %v151_v51 = vpop.permute.xlu0 %150 }
  0x9a   :  { %v152_v52 = vsel %vm62_vm3, %v149_v50, %v151_v51  ;;  %v153_v53 = vsel %vm62_vm3, %v151_v51, %v149_v50 }
  0x9b   :  { %v169_v54 = vmul.f32 %v162_v48, %v153_v53  ;;  %v170_v55 = vmul.f32 %v166_v49, %v152_v52 }
  0x9d   :  { %v592_v57 = vpop.permute.xlu1 %237  ;;  %v181_v60 = vpop.permute.xlu0 %180  ;;  %v176_v52 = vmul.f32 %v174_v46, %v169_v54  ;;  %v177_v53 = vmul.f32 %v174_v46, %v170_v55 }
  0xa1   :  { %v183_v61 = vpop.permute.xlu1 %182 }
  0xa2   :  { %v184_v62 = vsel %vm119_vm4, %v181_v60, %v183_v61  ;;  %v185_v63 = vsel %vm119_vm4, %v183_v61, %v181_v60 }
  0xa3   :  { %v201_v1 = vmul.f32 %v194_v58, %v184_v62  ;;  %v202_v2 = vmul.f32 %v198_v59, %v185_v63 }
  0xa5   :  { %v208_v56 = vmul.f32 %v580_v47, %v201_v1  ;;  %v209_v58 = vmul.f32 %v580_v47, %v202_v2  ;;  %v422_v47 = vld [vmem:[%s660_s5 + $0x10] ss:$8 sm:$0x3] }
  0xa6   :  { %v284_v10 = vrot.slane %v422_v47, %v539_v17 }
  0xd8   :  { %v379_v4 = vpop.f32.mrb[0].mxu0 }
  0xd9   :  { %v381_v5 = vpop.f32.mrb[1].mxu0  ;;  %v380_v14 = vadd.f32 %v379_v4, %v307_v40  ;;  %v418_v4 = vld [vmem:[%s660_s5 + $0x6] ss:$8 sm:$0x3] }
  0xda   :  { %v382_v25 = vadd.f32 %v381_v5, %v307_v40  ;;  %v226_v5 = vrot.slane %v418_v4, %v539_v17  ;;  %v230_v6 = vrot.slane %v418_v4, %v541_v18 }
  0xdb   :  { %v424_v37 = vmul.f32 -1.442695, %v380_v14 }
  0xdc   :  { %v425_v41 = vmul.f32 -1.442695, %v382_v25 }
  0xdd   :  { %434 = vpow2.f32 %v424_v37 }
  0xde   :  { %436 = vpow2.f32 %v425_v41 }
  0xe7   :  { %v435_v63 = vpop.eup %434 }
  0xe8   :  { %v390_v55 = vadd.f32 1.0, %v435_v63 }
  0xea   :  { %438 = vrcp.f32 %v390_v55 }
  0xec   :  { %v61_v12 = vpop.permute.xlu1 %60  ;;  %v59_v13 = vpop.permute.xlu0 %58 }
  0xed   :  { %v63_v15 = vsel %vm62_vm3, %v59_v13, %v61_v12  ;;  %v64_v19 = vsel %vm62_vm3, %v61_v12, %v59_v13  ;;  %v288_v13 = vrot.slane %v422_v47, %v541_v18 }
  0xee   :  { %v78_v20 = vmul.f32 %v71_v7, %v64_v19  ;;  %v79_v21 = vmul.f32 %v75_v8, %v63_v15 }
  0xf0   :  { %v85_v28 = vmul.f32 %v83_v42, %v78_v20  ;;  %v86_v29 = vmul.f32 %v83_v42, %v79_v21  ;;  %v118_v30 = vpop.permute.xlu1 %117  ;;  %v116_v31 = vpop.permute.xlu0 %115 }
  0xf1   :  { %v120_v38 = vsel %vm119_vm4, %v116_v31, %v118_v30  ;;  %v121_v39 = vsel %vm119_vm4, %v118_v30, %v116_v31 }
  0xf2   :  { %v87_v45 = vadd.f32 %v85_v28, %v40_v24  ;;  %v88_v48 = vadd.f32 %v86_v29, %v41_v26  ;;  %v137_v49 = vmul.f32 %v130_v22, %v120_v38  ;;  %v138_v40 = vmul.f32 %v134_v23, %v121_v39 }
  0xf4   :  { %v113_v50 = vadd.f32 %v111_v27, %v87_v45  ;;  %v114_v33 = vadd.f32 %v112_v32, %v88_v48  ;;  %v144_v51 = vmul.f32 %v142_v44, %v137_v49  ;;  %v145_v42 = vmul.f32 %v142_v44, %v138_v40  ;;  %v437_v44 = vpop.eup %436 }
  0xf5   :  { %v391_v1 = vadd.f32 1.0, %v437_v44  ;;  %v439_v32 = vpop.eup %438 }
  0xf6   :  { %v146_v34 = vadd.f32 %v144_v51, %v113_v50  ;;  %v147_v43 = vadd.f32 %v145_v42, %v114_v33 }
  0xf7   :  { %440 = vrcp.f32 %v391_v1 }
  0xf8   :  { %v178_v59 = vadd.f32 %v176_v52, %v146_v34  ;;  %v179_v60 = vadd.f32 %v177_v53, %v147_v43 }
  0xfa   :  { %v210_v61 = vadd.f32 %v208_v56, %v178_v59  ;;  %v211_v62 = vadd.f32 %v209_v58, %v179_v60 }
 0x101   :  { %v296_v54 = vpop.permute.xlu1 %295  ;;  %v264_v46 = vpop.permute.xlu0 %263 }
 0x102   :  { %v266_v21 = vmul.f32 %v264_v46, %v561_v35  ;;  %v267_v22 = vmul.f32 %v264_v46, %v563_v36  ;;  %v441_v37 = vpop.eup %440 }
 0x105   :  { %v213_v2 = vpop.permute.xlu1 %212  ;;  %v215_v7 = vpop.permute.xlu0 %214 }
 0x106   :  { %v216_v8 = vsel %vm62_vm3, %v213_v2, %v215_v7  ;;  %v217_v9 = vsel %vm62_vm3, %v215_v7, %v213_v2 }
 0x107   :  { %v233_v11 = vmul.f32 %v226_v5, %v217_v9  ;;  %v234_v12 = vmul.f32 %v230_v6, %v216_v8 }
 0x109   :  { %v240_v14 = vmul.f32 %v592_v57, %v233_v11  ;;  %v241_v15 = vmul.f32 %v592_v57, %v234_v12  ;;  %v273_v19 = vpop.permute.xlu1 %272  ;;  %v271_v20 = vpop.permute.xlu0 %270 }
 0x10a   :  { %v274_v23 = vsel %vm119_vm4, %v271_v20, %v273_v19  ;;  %v275_v17 = vsel %vm119_vm4, %v273_v19, %v271_v20 }
 0x10b   :  { %v242_v24 = vadd.f32 %v240_v14, %v210_v61  ;;  %v243_v25 = vadd.f32 %v241_v15, %v211_v62  ;;  %v291_v18 = vmul.f32 %v284_v10, %v274_v23  ;;  %v292_v26 = vmul.f32 %v288_v13, %v275_v17 }
 0x10d   :  { %v268_v27 = vadd.f32 %v266_v21, %v242_v24  ;;  %v269_v28 = vadd.f32 %v267_v22, %v243_v25  ;;  %v298_v29 = vmul.f32 %v296_v54, %v291_v18  ;;  %v299_v57 = vmul.f32 %v296_v54, %v292_v26 }
 0x10f   :  { %v300_v30 = vadd.f32 %v298_v29, %v268_v27  ;;  %v301_v31 = vadd.f32 %v299_v57, %v269_v28 }
 0x111   :  { %v396_v35 = vsub.f32 %v486_v0, %v300_v30  ;;  %v397_v36 = vsub.f32 %v493_v3, %v301_v31 }
 0x113   :  { %v398_v38 = vmul.f32 %v439_v32, %v396_v35  ;;  %v399_v39 = vmul.f32 %v441_v37, %v397_v36 }
 0x115   :  { %v400_v16 = vadd.f32 %v398_v38, %v300_v30  ;;  %v401_v45 = vadd.f32 %v399_v39, %v301_v31 }
 0x117   :  { %402 = vst [vmem:[%s661_s6] sm:$0xff] %v400_v16  ;;  %403 = vst [vmem:[%s661_s6 + $0x8] sm:$0xff] %v401_v45 }

</bundles_post_ra>
